<compile_context>
chip_gen: v7x
topology: tpu7x:2x2x1
jax: 0.10.0
libtpu: 0.0.40
codegen_flags: <defaults>
</compile_context>

<pallas_src>
import functools
from dataclasses import dataclass

import jax
import jax.numpy as jnp
from jax.experimental import pallas as pl
from jax.experimental.pallas import tpu as pltpu


@dataclass(frozen=True)
class ECTConfig:
    resolution: int = 32
    scale: float = 8
    radius: float = 1.1
    ect_type: str = "points"
    normalized: bool = False
    fixed: bool = True


def _ect_points_kernel(nh_ref, bidx_ref, a_ref, out_ref, *, num_graphs_padded, use_bf16):
    """One grid step: one (column-block j, node-tile i) pair.

    nh_ref  : [tile_n, T+1]      f32  node heights <x, v> augmented with a ones column
    bidx_ref: [1, tile_n]        i32  batch index per node (padded rows == num_graphs)
    a_ref   : [T+1, col_block]   f32  fused (-s/2)*expand / (s/2)*lin constant matrix
    out_ref : [B_pad, col_block] f32  resident accumulator slice of the flat [B_pad, T*R] ECT
    """
    i = pl.program_id(1)          # reduction axis over node tiles

    @pl.when(i == 0)
    def _init():
        out_ref[...] = jnp.zeros_like(out_ref)

    # z[n, c] = (scale/2) * (lin[c % R] - nh[n, c // R]) — single MXU matmul
    # (K = T+1; the lin/scale/expand work was folded into A in the wrapper).
    z = jnp.dot(nh_ref[...], a_ref[...], preferred_element_type=jnp.float32)

    if use_bf16:
        # TODO(synk): bf16 EUP/VPU is ~2x on v6e/v7x but adds ~2^-9 relative error; only
        # enable when the caller's tolerance allows it. Not beneficial on v5e (no bf16 VPU/EUP).
        z = z.astype(jnp.bfloat16)

    # sigmoid(2*z) == 0.5*tanh(z) + 0.5 : exactly one EUP push per element.
    half = jnp.array(0.5, z.dtype)
    ecc = jnp.tanh(z) * half + half                                     # [tile_n, col_block]

    # Segment-sum over nodes as an MXU matmul: onehot[b, n] = (batch[n] == b).
    bidx = bidx_ref[...]                                                # [1, tile_n]
    tile_n = bidx.shape[-1]
    graphs = jax.lax.broadcasted_iota(jnp.int32, (num_graphs_padded, tile_n), 0)
    onehot = (graphs == bidx).astype(ecc.dtype)                         # [B_pad, tile_n]
    out_ref[...] += jnp.dot(onehot, ecc, preferred_element_type=jnp.float32)


def _num_tensorcores():
    """TensorCores reachable via megacore 'parallel' sharding (v7x: 2, v5e/v6e: 1)."""
    try:
        kind = jax.devices()[0].device_kind.lower()
    except Exception:
        return 1
    return 2 if "v7" in kind else 1


def compute_ect_points_pallas(x, v, radius, resolution, scale, index, num_graphs,
                              use_bf16_transcendentals=False):
    x = x.astype(jnp.float32)
    v = v.astype(jnp.float32)
    N, D = x.shape
    Dv, T = v.shape
    assert D == Dv, "x feature dim must match v's ndims"
    R = int(resolution)
    TR = T * R

    # Node heights: tiny (D~3) contraction -> plain XLA, hoisted out of the kernel.
    nh = jnp.dot(x, v, precision=jax.lax.Precision.HIGHEST)             # [N, T]
    # Augment with a ones column so z = nh_aug @ A fuses expansion, lin subtract and scale.
    nh_aug = jnp.concatenate([nh, jnp.ones((N, 1), jnp.float32)], axis=1)  # [N, T+1]

    # Fused constant matrix A: A[t, t*R + r] = -(scale/2); A[T, t*R + r] = (scale/2)*lin[r].
    lin = jnp.linspace(-radius, radius, R, dtype=jnp.float32)
    half_scale = 0.5 * float(scale)
    expand = jnp.repeat(jnp.eye(T, dtype=jnp.float32), R, axis=1)          # [T, T*R]
    a_mat = jnp.concatenate(
        [-half_scale * expand, (half_scale * jnp.tile(lin, T))[None, :]], axis=0)  # [T+1, TR]

    # Column blocking over the flattened T*R axis: one block per TensorCore. On single-TC
    # chips (v5e/v6e) a split only doubles grid-step overhead and re-streams nh.
    cores = _num_tensorcores()
    if cores > 1 and TR % cores == 0 and (TR // cores) % 128 == 0:
        col_block, n_col = TR // cores, cores
    else:
        col_block, n_col = TR, 1                                        # full dim (always legal)

    # Node tiling (reduction axis). Budget the real per-step live set: z + ecc intermediates
    # (2 * tile_n * col_block * 4 B) plus the double-buffered, lane-padded nh_aug block
    # (2 * tile_n * 128 * 4 B). 24 MiB budget keeps us well inside v7x's 64 MiB VMEM.
    vmem_budget = 24 * 1024 * 1024
    per_node_bytes = 2 * col_block * 4 + 2 * 128 * 4
    n_pad128 = int(pl.cdiv(N, 128) * 128)
    tile_n = int(max(128, min(4096, (vmem_budget // per_node_bytes) // 128 * 128, n_pad128)))
    n_pad = int(pl.cdiv(N, tile_n) * tile_n)
    n_tiles = n_pad // tile_n

    # Pad graphs to a sublane multiple so the resident accumulator uses unmasked stores.
    # Padded node rows get batch index == num_graphs, so they either hit a padded output
    # row (sliced off below) or match nothing — never a real graph.
    b_pad = int(pl.cdiv(num_graphs, 8) * 8)
    nh_p = jnp.pad(nh_aug, ((0, n_pad - N), (0, 0)))
    bidx = jnp.pad(index.astype(jnp.int32), (0, n_pad - N),
                   constant_values=num_graphs).reshape(1, n_pad)

    kernel = functools.partial(
        _ect_points_kernel, num_graphs_padded=b_pad,
        use_bf16=bool(use_bf16_transcendentals))

    out_flat = pl.pallas_call(
        kernel,
        out_shape=jax.ShapeDtypeStruct((b_pad, TR), jnp.float32),
        grid_spec=pltpu.PrefetchScalarGridSpec(
            num_scalar_prefetch=0,
            grid=(n_col, n_tiles),
            in_specs=[
                pl.BlockSpec((tile_n, T + 1), lambda j, i: (i, 0)),     # nh_aug node tile
                pl.BlockSpec((1, tile_n), lambda j, i: (0, i)),         # batch index (nodes on lanes)
                pl.BlockSpec((T + 1, col_block), lambda j, i: (0, j)),  # fused lin/expand constant
            ],
            out_specs=pl.BlockSpec((b_pad, col_block), lambda j, i: (0, j)),
        ),
        compiler_params=pltpu.CompilerParams(
            dimension_semantics=("parallel", "arbitrary"),
            vmem_limit_bytes=40 * 1024 * 1024),
    )(nh_p, bidx, a_mat)

    return out_flat[:num_graphs].reshape(num_graphs, T, R)


class ECTLayer:
    """JAX/Pallas port of dect.nn.ECTLayer (points, fixed directions)."""

    def __init__(self, config: ECTConfig, v=None):
        self.config = config
        if config.ect_type != "points":
            # TODO(synk): 'edges'/'faces' ECT need edge_index/face gather paths; not implemented.
            raise NotImplementedError("only ect_type='points' is implemented")
        if not config.fixed:
            # TODO(synk): fixed=False uses a geotorch sphere constraint (training-time only).
            raise NotImplementedError("only fixed=True directions are implemented")
        # Stored as [num_thetas, ndims], like the torch module (v.movedim(-1, -2)).
        self.v = jnp.moveaxis(jnp.asarray(v, jnp.float32), -1, -2)

    def __call__(self, x, batch, num_graphs):
        v = jnp.moveaxis(self.v, -1, -2)  # back to [ndims, num_thetas]
        ect = compute_ect_points_pallas(
            x, v, self.config.radius, self.config.resolution,
            self.config.scale, batch, num_graphs)
        if self.config.normalized:
            # TODO(synk): normalize() expects the 4D multi-channel ECT; not implemented here.
            raise NotImplementedError
        return jnp.squeeze(ect)


def compute_ect_points_ref(x, v, radius, resolution, scale, index, num_graphs):
    """Pure-JAX reference for correctness checking."""
    nh = jnp.dot(x, v, precision=jax.lax.Precision.HIGHEST)              # [N, T]
    lin = jnp.linspace(-radius, radius, resolution, dtype=jnp.float32)   # [R]
    ecc = jax.nn.sigmoid(scale * (lin[None, None, :] - nh[:, :, None]))  # [N, T, R]
    onehot = (index[:, None] == jnp.arange(num_graphs)[None, :]).astype(jnp.float32)
    return jnp.einsum("nb,ntr->btr", onehot, ecc,
                      precision=jax.lax.Precision.HIGHEST)               # [B, T, R]


if __name__ == "__main__":
    key = jax.random.PRNGKey(0)
    kx, kv = jax.random.split(key)

    B = 2            # point clouds in the batch
    n_per = 32
    N = B * n_per    # total number of nodes
    D = 3            # ndims
    T = 16           # num_thetas
    cfg = ECTConfig(resolution=32, scale=8.0, radius=1.1,
                    ect_type="points", normalized=False, fixed=True)

    # Deterministic synthetic inputs / parameters.
    x = jax.random.normal(kx, (N, D), dtype=jnp.float32)
    x = x / (jnp.max(jnp.linalg.norm(x, axis=-1)) + 1e-6)      # fit inside unit ball
    v = jax.random.normal(kv, (D, T), dtype=jnp.float32)        # [ndims, num_thetas]
    v = v / jnp.linalg.norm(v, axis=0, keepdims=True)           # unit directions
    batch = jnp.repeat(jnp.arange(B, dtype=jnp.int32), n_per)   # sorted batch index

    layer = ECTLayer(cfg, v=v)
    ect = layer(x, batch, num_graphs=B)
    jax.block_until_ready(ect)

    ref = jnp.squeeze(compute_ect_points_ref(
        x, v, cfg.radius, cfg.resolution, cfg.scale, batch, B))
    assert ect.shape == (B, T, cfg.resolution), ect.shape
    max_err = float(jnp.max(jnp.abs(ect - ref)))
    assert jnp.allclose(ect, ref, atol=2e-4, rtol=2e-4), max_err
    print("KERNEL_OK")
</pallas_src>

<mosaic_0001>
module attributes {stable_mosaic.version = 11 : i64} {
  func.func @_ect_points_kernel(%arg0: i32, %arg1: i32, %arg2: memref<128x17xf32, #tpu.memory_space<vmem>>, %arg3: memref<1x128xi32, #tpu.memory_space<vmem>>, %arg4: memref<17x512xf32, #tpu.memory_space<vmem>>, %arg5: memref<8x512xf32, #tpu.memory_space<vmem>>) attributes {dimension_semantics = [#tpu.dimension_semantics<parallel>, #tpu.dimension_semantics<arbitrary>], iteration_bounds = array<i64: 1, 1>, scalar_prefetch = 0 : i64, scratch_operands = 0 : i64, tpu.core_type = #tpu.core_type<tc>, window_params = [{transform_indices = @transform_0, window_bounds = array<i64: 128, 17>}, {transform_indices = @transform_1, window_bounds = array<i64: 1, 128>}, {transform_indices = @transform_2, window_bounds = array<i64: 17, 512>}, {transform_indices = @transform_3, window_bounds = array<i64: 8, 512>}]} {
    %c0_i32 = arith.constant 0 : i32
    %0 = arith.cmpi eq, %arg1, %c0_i32 : i32
    %1 = arith.extui %0 : i1 to i32
    %c0_i32_0 = arith.constant 0 : i32
    %2 = arith.cmpi ne, %1, %c0_i32_0 : i32
    scf.if %2 {
      %cst_13 = arith.constant 0.000000e+00 : f32
      %21 = vector.broadcast %cst_13 : f32 to vector<8x512xf32>
      %c0_14 = arith.constant 0 : index
      %c0_15 = arith.constant 0 : index
      %22 = vector.load %arg5[%c0_14, %c0_15] : memref<8x512xf32, #tpu.memory_space<vmem>>, vector<8x512xf32>
      tpu.vector_store %arg5[%c0_14, %c0_15], %21 {strides = array<i32>} : memref<8x512xf32, #tpu.memory_space<vmem>>, vector<8x512xf32>,
    } else {
    }
    %c0 = arith.constant 0 : index
    %c0_1 = arith.constant 0 : index
    %3 = vector.load %arg2[%c0, %c0_1] : memref<128x17xf32, #tpu.memory_space<vmem>>, vector<128x17xf32>
    %c0_2 = arith.constant 0 : index
    %c0_3 = arith.constant 0 : index
    %4 = vector.load %arg4[%c0_2, %c0_3] : memref<17x512xf32, #tpu.memory_space<vmem>>, vector<17x512xf32>
    %cst = arith.constant dense<0.000000e+00> : vector<128x512xf32>
    %5 = tpu.matmul %3, %4, %cst {dimension_numbers = #tpu.dot_dimension_numbers<[1], [0], [0], [1], [0, 0, 1, 1], [], []>} : vector<128x17xf32>, vector<17x512xf32>, vector<128x512xf32> -> vector<128x512xf32>
    %6 = math.tanh %5 : vector<128x512xf32>
    %cst_4 = arith.constant 5.000000e-01 : f32
    %7 = vector.broadcast %cst_4 : f32 to vector<128x512xf32>
    %8 = arith.mulf %6, %7 : vector<128x512xf32>
    %cst_5 = arith.constant 5.000000e-01 : f32
    %9 = vector.broadcast %cst_5 : f32 to vector<128x512xf32>
    %10 = arith.addf %8, %9 : vector<128x512xf32>
    %c0_6 = arith.constant 0 : index
    %c0_7 = arith.constant 0 : index
    %11 = vector.load %arg3[%c0_6, %c0_7] : memref<1x128xi32, #tpu.memory_space<vmem>>, vector<1x128xi32>
    %12 = tpu.iota {dimensions = array<i32: 0>} : vector<8x128xi32>
    %13 = vector.broadcast %11 : vector<1x128xi32> to vector<8x128xi32>
    %14 = arith.cmpi eq, %12, %13 : vector<8x128xi32>
    %15 = arith.extui %14 : vector<8x128xi1> to vector<8x128xi32>
    %16 = arith.sitofp %15 : vector<8x128xi32> to vector<8x128xf32>
    %c0_8 = arith.constant 0 : index
    %c0_9 = arith.constant 0 : index
    %17 = vector.load %arg5[%c0_8, %c0_9] : memref<8x512xf32, #tpu.memory_space<vmem>>, vector<8x512xf32>
    %cst_10 = arith.constant dense<0.000000e+00> : vector<8x512xf32>
    %18 = tpu.matmul %16, %10, %cst_10 {dimension_numbers = #tpu.dot_dimension_numbers<[1], [0], [0], [1], [0, 0, 1, 1], [], []>} : vector<8x128xf32>, vector<128x512xf32>, vector<8x512xf32> -> vector<8x512xf32>
    %19 = arith.addf %17, %18 : vector<8x512xf32>
    %c0_11 = arith.constant 0 : index
    %c0_12 = arith.constant 0 : index
    %20 = vector.load %arg5[%c0_11, %c0_12] : memref<8x512xf32, #tpu.memory_space<vmem>>, vector<8x512xf32>
    tpu.vector_store %arg5[%c0_11, %c0_12], %19 {strides = array<i32>} : memref<8x512xf32, #tpu.memory_space<vmem>>, vector<8x512xf32>,
    return
  }
  func.func @transform_0(%arg0: i32, %arg1: i32) -> (i32, i32) {
    %c0_i32 = arith.constant 0 : i32
    %c0_i32_0 = arith.constant 0 : i32
    return %arg1, %c0_i32 : i32, i32
  }
  func.func @transform_1(%arg0: i32, %arg1: i32) -> (i32, i32) {
    %c0_i32 = arith.constant 0 : i32
    %c0_i32_0 = arith.constant 0 : i32
    return %c0_i32, %arg1 : i32, i32
  }
  func.func @transform_2(%arg0: i32, %arg1: i32) -> (i32, i32) {
    %c0_i32 = arith.constant 0 : i32
    %c0_i32_0 = arith.constant 0 : i32
    return %c0_i32, %arg0 : i32, i32
  }
  func.func @transform_3(%arg0: i32, %arg1: i32) -> (i32, i32) {
    %c0_i32 = arith.constant 0 : i32
    %c0_i32_0 = arith.constant 0 : i32
    return %c0_i32, %arg0 : i32, i32
  }
}

</mosaic_0001>

<bundles_post_ra>
// kernel: tpu_custom_call.1
= control target key start
LH: loop header
LB: loop body
LE: loop exit
PB: predicated region body
PF: predicated region fallthrough
CT: control target
= control target key end

     0   :  { %v1072_v7 = vmov 0.0   ;;  %vm100_vm0 = vcmask 1040384   ;;  %vm51_vm1 = vcmask 138240   ;;  %s1260_s0 = inlined_call_operand.vmem [shape: f32[128,17], index: 0, kind: input, shape index: {}]   ;;  %s1261_s1 = inlined_call_operand.vmem [shape: s32[1,128], index: 1, kind: input, shape index: {}]   ;;  %s1262_s2 = inlined_call_operand.vmem [shape: f32[17,512], index: 2, kind: input, shape index: {}]   ;;  %s1263_s3 = inlined_call_operand.hbm [shape: f32[8,512], index: 3, kind: output, shape index: {}]  }
   0x1   :  { %v40_v0 = vld [vmem:[%s1262_s2 + $0x8] sm:$0xff]  ;;  %v42_v2 = vld [vmem:[%s1262_s2 + $0x18] sm:$0xff]  ;;  %v39_v5 = vld [vmem:[%s1262_s2] sm:$0xff]  ;;  %177 = vmatprep.mubr.f32.mxu0 %v1072_v7  ;;  %338 = vmatprep.mubr.f32.mxu1 %v1072_v7 }
   0x2   :  { %v44_v1 = vld [vmem:[%s1262_s2 + $0x28] sm:$0xff]  ;;  %v46_v4 = vld [vmem:[%s1262_s2 + $0x38] sm:$0xff]  ;;  %v43_v6 = vld [vmem:[%s1262_s2 + $0x20] sm:$0xff] }
   0x3   :  { %v845_v3 = vpack.c.bf16 %v44_v1, %v40_v0  ;;  %v849_v8 = vpack.c.bf16 %v46_v4, %v42_v2  ;;  %v847_v9 = vpack.c.bf16 %v43_v6, %v39_v5  ;;  %v41_v10 = vld [vmem:[%s1262_s2 + $0x10] sm:$0xff]  ;;  %v48_v12 = vld [vmem:[%s1262_s2 + $0x48] sm:$0x1]  ;;  %v50_v14 = vld [vmem:[%s1262_s2 + $0x58] sm:$0x1] }
   0x4   :  { %v45_v11 = vld [vmem:[%s1262_s2 + $0x30] sm:$0xff]  ;;  %v47_v15 = vld [vmem:[%s1262_s2 + $0x40] sm:$0x1] }
   0x5   :  { %846 = vmatprep.subr.bf16.mxu0 %v845_v3  ;;  %v851_v13 = vpack.c.bf16 %v45_v11, %v41_v10  ;;  %850 = vmatprep.subr.bf16.mxu1 %v849_v8  ;;  %v49_v16 = vld [vmem:[%s1262_s2 + $0x50] sm:$0x1]  ;;  %v23_v17 = vld [vmem:[%s1260_s0] sm:$0xff] }
   0x6   :  { %848 = vmatpush1.bf16.msra.mxu0 %v847_v9 }
   0x7   :  { %852 = vmatpush1.bf16.msra.mxu1 %v851_v13  ;;  %805 = vmatprep.subr.msk.mxu0 %vm100_vm0, %v48_v12 }
   0x8   :  { %823 = vmatprep.subr.msk.mxu1 %vm100_vm0, %v50_v14 }
   0xa   :  { %806 = vmatpush1.msk.msra.mxu0 %vm100_vm0, %v47_v15 }
   0xb   :  { %824 = vmatpush1.msk.msra.mxu1 %vm100_vm0, %v49_v16  ;;  %807 = vmatmul.mubr.msk.f32.vlgmr.msra.gmra.mrb[0].mxu0 %vm51_vm1, %v23_v17 }
   0xc   :  { %8 = vsyncpa [#allocation3], 0  ;;  %825 = vmatmul.mubr.msk.f32.vlgmr.msra.gmra.mrb[0].mxu1 %vm51_vm1, %v23_v17  ;;  %183 = vmatprep.mubr.f32.mxu0 %v1072_v7  ;;  %v24_v18 = vld [vmem:[%s1260_s0 + $0x8] sm:$0xff]  ;;  %v25_v19 = vld [vmem:[%s1260_s0 + $0x10] sm:$0xff]  ;;  %s1074_s13 = smov [#allocation2]  }
   0xd   :  { %344 = vmatprep.mubr.f32.mxu1 %v1072_v7  ;;  %v26_v20 = vld [vmem:[%s1260_s0 + $0x18] sm:$0xff]  ;;  %v27_v21 = vld [vmem:[%s1260_s0 + $0x20] sm:$0xff]  ;;  %v28_v22 = vld [vmem:[%s1260_s0 + $0x28] sm:$0xff]  ;;  %s797_s14 = sshll.u32 %s1074_s13, 4  ;;  %s798_s14 = int_to_ptr.vmem [resolvable:$true] %s797_s14 }
   0xe   :  { %v29_v23 = vld [vmem:[%s1260_s0 + $0x30] sm:$0xff]  ;;  %v30_v24 = vld [vmem:[%s1260_s0 + $0x38] sm:$0xff]  ;;  %v31_v25 = vld [vmem:[%s1260_s0 + $0x40] sm:$0xff]  ;;  %p1053_p1 = scmp.lt.s32.totalorder %s798_s14, %s798_s14 }
   0xf   :  { %808 = vmatmul.mubr.msk.f32.gmra.mrb[2].mxu0 %vm51_vm1, %v24_v18  ;;  %v32_v26 = vld [vmem:[%s1260_s0 + $0x48] sm:$0xff]  ;;  %v33_v27 = vld [vmem:[%s1260_s0 + $0x50] sm:$0xff]  ;;  %v34_v28 = vld [vmem:[%s1260_s0 + $0x58] sm:$0xff] }
  0x10   :  { %826 = vmatmul.mubr.msk.f32.gmra.mrb[2].mxu1 %vm51_vm1, %v24_v18  ;;  %189 = vmatprep.mubr.f32.mxu0 %v1072_v7  ;;  %v35_v29 = vld [vmem:[%s1260_s0 + $0x60] sm:$0xff]  ;;  %v36_v30 = vld [vmem:[%s1260_s0 + $0x68] sm:$0xff]  ;;  %v37_v31 = vld [vmem:[%s1260_s0 + $0x70] sm:$0xff] }
  0x11   :  { %350 = vmatprep.mubr.f32.mxu1 %v1072_v7  ;;  %v38_v32 = vld [vmem:[%s1260_s0 + $0x78] sm:$0xff] }
  0x13   :  { %809 = vmatmul.mubr.msk.f32.gmra.mrb[4].mxu0 %vm51_vm1, %v25_v19 }
  0x14   :  { %827 = vmatmul.mubr.msk.f32.gmra.mrb[4].mxu1 %vm51_vm1, %v25_v19  ;;  %195 = vmatprep.mubr.f32.mxu0 %v1072_v7 }
  0x15   :  { %356 = vmatprep.mubr.f32.mxu1 %v1072_v7 }
  0x17   :  { %810 = vmatmul.mubr.msk.f32.gmra.mrb[6].mxu0 %vm51_vm1, %v26_v20 }
  0x18   :  { %828 = vmatmul.mubr.msk.f32.gmra.mrb[6].mxu1 %vm51_vm1, %v26_v20  ;;  %201 = vmatprep.mubr.f32.mxu0 %v1072_v7 }
  0x19   :  { %362 = vmatprep.mubr.f32.mxu1 %v1072_v7 }
  0x1b   :  { %811 = vmatmul.mubr.msk.f32.gmra.mrb[8].mxu0 %vm51_vm1, %v27_v21 }
  0x1c   :  { %829 = vmatmul.mubr.msk.f32.gmra.mrb[8].mxu1 %vm51_vm1, %v27_v21  ;;  %207 = vmatprep.mubr.f32.mxu0 %v1072_v7 }
  0x1d   :  { %368 = vmatprep.mubr.f32.mxu1 %v1072_v7 }
  0x1f   :  { %812 = vmatmul.mubr.msk.f32.gmra.mrb[10].mxu0 %vm51_vm1, %v28_v22 }
  0x20   :  { %830 = vmatmul.mubr.msk.f32.gmra.mrb[10].mxu1 %vm51_vm1, %v28_v22  ;;  %213 = vmatprep.mubr.f32.mxu0 %v1072_v7 }
  0x21   :  { %374 = vmatprep.mubr.f32.mxu1 %v1072_v7 }
  0x23   :  { %813 = vmatmul.mubr.msk.f32.gmra.mrb[12].mxu0 %vm51_vm1, %v29_v23 }
  0x24   :  { %831 = vmatmul.mubr.msk.f32.gmra.mrb[12].mxu1 %vm51_vm1, %v29_v23  ;;  %219 = vmatprep.mubr.f32.mxu0 %v1072_v7 }
  0x25   :  { %380 = vmatprep.mubr.f32.mxu1 %v1072_v7 }
  0x27   :  { %814 = vmatmul.mubr.msk.f32.gmra.mrb[14].mxu0 %vm51_vm1, %v30_v24 }
  0x28   :  { %832 = vmatmul.mubr.msk.f32.gmra.mrb[14].mxu1 %vm51_vm1, %v30_v24  ;;  %225 = vmatprep.mubr.f32.mxu0 %v1072_v7 }
  0x29   :  { %386 = vmatprep.mubr.f32.mxu1 %v1072_v7 }
  0x2b   :  { %815 = vmatmul.mubr.msk.f32.gmra.mrb[16].mxu0 %vm51_vm1, %v31_v25 }
  0x2c   :  { %833 = vmatmul.mubr.msk.f32.gmra.mrb[16].mxu1 %vm51_vm1, %v31_v25  ;;  %231 = vmatprep.mubr.f32.mxu0 %v1072_v7 }
  0x2d   :  { %392 = vmatprep.mubr.f32.mxu1 %v1072_v7 }
  0x2f   :  { %816 = vmatmul.mubr.msk.f32.gmra.mrb[18].mxu0 %vm51_vm1, %v32_v26 }
  0x30   :  { %834 = vmatmul.mubr.msk.f32.gmra.mrb[18].mxu1 %vm51_vm1, %v32_v26  ;;  %237 = vmatprep.mubr.f32.mxu0 %v1072_v7 }
  0x31   :  { %398 = vmatprep.mubr.f32.mxu1 %v1072_v7 }
  0x33   :  { %817 = vmatmul.mubr.msk.f32.gmra.mrb[20].mxu0 %vm51_vm1, %v33_v27 }
  0x34   :  { %835 = vmatmul.mubr.msk.f32.gmra.mrb[20].mxu1 %vm51_vm1, %v33_v27  ;;  %243 = vmatprep.mubr.f32.mxu0 %v1072_v7 }
  0x35   :  { %404 = vmatprep.mubr.f32.mxu1 %v1072_v7 }
  0x37   :  { %818 = vmatmul.mubr.msk.f32.gmra.mrb[22].mxu0 %vm51_vm1, %v34_v28 }
  0x38   :  { %836 = vmatmul.mubr.msk.f32.gmra.mrb[22].mxu1 %vm51_vm1, %v34_v28  ;;  %249 = vmatprep.mubr.f32.mxu0 %v1072_v7 }
  0x39   :  { %410 = vmatprep.mubr.f32.mxu1 %v1072_v7 }
  0x3b   :  { %819 = vmatmul.mubr.msk.f32.gmra.mrb[24].mxu0 %vm51_vm1, %v35_v29 }
  0x3c   :  { %837 = vmatmul.mubr.msk.f32.gmra.mrb[24].mxu1 %vm51_vm1, %v35_v29  ;;  %255 = vmatprep.mubr.f32.mxu0 %v1072_v7 }
  0x3d   :  { %416 = vmatprep.mubr.f32.mxu1 %v1072_v7 }
  0x3f   :  { %820 = vmatmul.mubr.msk.f32.gmra.mrb[26].mxu0 %vm51_vm1, %v36_v30 }
  0x40   :  { %838 = vmatmul.mubr.msk.f32.gmra.mrb[26].mxu1 %vm51_vm1, %v36_v30  ;;  %261 = vmatprep.mubr.f32.mxu0 %v1072_v7 }
  0x41   :  { %422 = vmatprep.mubr.f32.mxu1 %v1072_v7 }
  0x43   :  { %821 = vmatmul.mubr.msk.f32.gmra.mrb[28].mxu0 %vm51_vm1, %v37_v31 }
  0x44   :  { %839 = vmatmul.mubr.msk.f32.gmra.mrb[28].mxu1 %vm51_vm1, %v37_v31  ;;  %267 = vmatprep.mubr.f32.mxu0 %v1072_v7 }
  0x45   :  { %428 = vmatprep.mubr.f32.mxu1 %v1072_v7 }
  0x47   :  { %822 = vmatmul.mubr.msk.f32.gmra.mrb[30].mxu0 %vm51_vm1, %v38_v32 }
  0x48   :  { %840 = vmatmul.mubr.msk.f32.gmra.mrb[30].mxu1 %vm51_vm1, %v38_v32  ;;  %705 = vmatprep.mubr.f32.mxu0 %v1072_v7 }
  0x49   :  { %776 = vmatprep.mubr.f32.mxu1 %v1072_v7 }
  0xde   :  { %v179_v33 = vpop.f32.mrb[0].mxu0 }
  0xdf   :  { %920 = vtanh.f32 %v179_v33  ;;  %v340_v34 = vpop.f32.mrb[0].mxu1  ;;  %v181_v35 = vpop.f32.mrb[1].mxu0 }
  0xe0   :  { %922 = vtanh.f32 %v340_v34  ;;  %v342_v36 = vpop.f32.mrb[1].mxu1 }
  0xe1   :  { %924 = vtanh.f32 %v181_v35 }
  0xe2   :  { %926 = vtanh.f32 %v342_v36  ;;  %v185_v37 = vpop.f32.mrb[2].mxu0 }
  0xe3   :  { %928 = vtanh.f32 %v185_v37  ;;  %v346_v38 = vpop.f32.mrb[2].mxu1  ;;  %v187_v39 = vpop.f32.mrb[3].mxu0 }
  0xe4   :  { %930 = vtanh.f32 %v346_v38  ;;  %v348_v40 = vpop.f32.mrb[3].mxu1 }
  0xe5   :  { %932 = vtanh.f32 %v187_v39 }
  0xe6   :  { %934 = vtanh.f32 %v348_v40  ;;  %v191_v41 = vpop.f32.mrb[4].mxu0 }
  0xe7   :  { %936 = vtanh.f32 %v191_v41  ;;  %v352_v42 = vpop.f32.mrb[4].mxu1  ;;  %v193_v43 = vpop.f32.mrb[5].mxu0 }
  0xe8   :  { %938 = vtanh.f32 %v352_v42  ;;  %v354_v44 = vpop.f32.mrb[5].mxu1 }
  0xe9   :  { %v921_v45 = vpop.eup %920  ;;  %940 = vtanh.f32 %v193_v43 }
  0xea   :  { %v923_v46 = vpop.eup %922  ;;  %942 = vtanh.f32 %v354_v44  ;;  %v197_v47 = vpop.f32.mrb[6].mxu0  ;;  %v499_v52 = vmul.f32 0.5, %v921_v45 }
  0xeb   :  { %v925_v48 = vpop.eup %924  ;;  %944 = vtanh.f32 %v197_v47  ;;  %v358_v49 = vpop.f32.mrb[6].mxu1  ;;  %v501_v55 = vmul.f32 0.5, %v923_v46 }
  0xec   :  { %v199_v50 = vpop.f32.mrb[7].mxu0  ;;  %v927_v51 = vpop.eup %926  ;;  %946 = vtanh.f32 %v358_v49  ;;  %v500_v57 = vmul.f32 0.5, %v925_v48  ;;  %v563_v2 = vadd.f32 0.5, %v499_v52 }
  0xed   :  { %v360_v53 = vpop.f32.mrb[7].mxu1  ;;  %v929_v54 = vpop.eup %928  ;;  %948 = vtanh.f32 %v199_v50  ;;  %v502_v61 = vmul.f32 0.5, %v927_v51  ;;  %v565_v7 = vadd.f32 0.5, %v501_v55 }
  0xee   :  { %v931_v56 = vpop.eup %930  ;;  %v503_v58 = vmul.f32 0.5, %v929_v54  ;;  %950 = vtanh.f32 %v360_v53  ;;  %v203_v59 = vpop.f32.mrb[8].mxu0  ;;  %v564_v11 = vadd.f32 0.5, %v500_v57 }
  0xef   :  { %v933_v60 = vpop.eup %932  ;;  %v505_v62 = vmul.f32 0.5, %v931_v56  ;;  %952 = vtanh.f32 %v203_v59  ;;  %v364_v63 = vpop.f32.mrb[8].mxu1  ;;  %v566_v16 = vadd.f32 0.5, %v502_v61 }
  0xf0   :  { %v205_v0 = vpop.f32.mrb[9].mxu0  ;;  %v935_v1 = vpop.eup %934  ;;  %v567_v3 = vadd.f32 0.5, %v503_v58  ;;  %v504_v4 = vmul.f32 0.5, %v933_v60  ;;  %954 = vtanh.f32 %v364_v63 }
  0xf1   :  { %v366_v5 = vpop.f32.mrb[9].mxu1  ;;  %v937_v6 = vpop.eup %936  ;;  %v569_v8 = vadd.f32 0.5, %v505_v62  ;;  %v506_v9 = vmul.f32 0.5, %v935_v1  ;;  %956 = vtanh.f32 %v205_v0 }
  0xf2   :  { %v939_v10 = vpop.eup %938  ;;  %v855_v12 = vpack.c.bf16 %v567_v3, %v563_v2  ;;  %v568_v13 = vadd.f32 0.5, %v504_v4  ;;  %958 = vtanh.f32 %v366_v5  ;;  %v209_v14 = vpop.f32.mrb[10].mxu0  ;;  %v507_v22 = vmul.f32 0.5, %v937_v6 }
  0xf3   :  { %v941_v15 = vpop.eup %940  ;;  %v887_v17 = vpack.c.bf16 %v569_v8, %v565_v7  ;;  %v570_v18 = vadd.f32 0.5, %v506_v9  ;;  %960 = vtanh.f32 %v209_v14  ;;  %v370_v19 = vpop.f32.mrb[10].mxu1  ;;  %v509_v26 = vmul.f32 0.5, %v939_v10 }
  0xf4   :  { %v211_v20 = vpop.f32.mrb[11].mxu0  ;;  %v943_v21 = vpop.eup %942  ;;  %962 = vtanh.f32 %v370_v19  ;;  %v853_v24 = vpack.c.bf16 %v568_v13, %v564_v11  ;;  %v508_v29 = vmul.f32 0.5, %v941_v15  ;;  %v571_v38 = vadd.f32 0.5, %v507_v22 }
  0xf5   :  { %v372_v23 = vpop.f32.mrb[11].mxu1  ;;  %v945_v25 = vpop.eup %944  ;;  %964 = vtanh.f32 %v211_v20  ;;  %v885_v27 = vpack.c.bf16 %v570_v18, %v566_v16  ;;  %v510_v33 = vmul.f32 0.5, %v943_v21  ;;  %v573_v43 = vadd.f32 0.5, %v509_v26 }
  0xf6   :  { %v947_v28 = vpop.eup %946  ;;  %v511_v30 = vmul.f32 0.5, %v945_v25  ;;  %966 = vtanh.f32 %v372_v23  ;;  %854 = vmatprep.subr.bf16.mxu0 %v853_v24  ;;  %v215_v31 = vpop.f32.mrb[12].mxu0  ;;  %v572_v47 = vadd.f32 0.5, %v508_v29 }
  0xf7   :  { %v949_v32 = vpop.eup %948  ;;  %v513_v34 = vmul.f32 0.5, %v947_v28  ;;  %886 = vmatprep.subr.bf16.mxu1 %v885_v27  ;;  %968 = vtanh.f32 %v215_v31  ;;  %v376_v35 = vpop.f32.mrb[12].mxu1  ;;  %856 = vmatpush1.bf16.msra.mxu0 %v855_v12  ;;  %v574_v52 = vadd.f32 0.5, %v510_v33 }
  0xf8   :  { %v217_v36 = vpop.f32.mrb[13].mxu0  ;;  %v951_v37 = vpop.eup %950  ;;  %v575_v39 = vadd.f32 0.5, %v511_v30  ;;  %v512_v40 = vmul.f32 0.5, %v949_v32  ;;  %970 = vtanh.f32 %v376_v35  ;;  %888 = vmatpush1.bf16.msra.mxu1 %v887_v17 }
  0xf9   :  { %v378_v41 = vpop.f32.mrb[13].mxu1  ;;  %v953_v42 = vpop.eup %952  ;;  %v577_v44 = vadd.f32 0.5, %v513_v34  ;;  %v514_v45 = vmul.f32 0.5, %v951_v37  ;;  %972 = vtanh.f32 %v217_v36 }
  0xfa   :  { %v955_v46 = vpop.eup %954  ;;  %v859_v48 = vpack.c.bf16 %v575_v39, %v571_v38  ;;  %v576_v49 = vadd.f32 0.5, %v512_v40  ;;  %974 = vtanh.f32 %v378_v41  ;;  %v221_v50 = vpop.f32.mrb[14].mxu0  ;;  %v515_v58 = vmul.f32 0.5, %v953_v42 }
  0xfb   :  { %v957_v51 = vpop.eup %956  ;;  %v891_v53 = vpack.c.bf16 %v577_v44, %v573_v43  ;;  %v578_v54 = vadd.f32 0.5, %v514_v45  ;;  %976 = vtanh.f32 %v221_v50  ;;  %v382_v55 = vpop.f32.mrb[14].mxu1  ;;  %v517_v62 = vmul.f32 0.5, %v955_v46 }
  0xfc   :  { %v223_v56 = vpop.f32.mrb[15].mxu0  ;;  %v959_v57 = vpop.eup %958  ;;  %978 = vtanh.f32 %v382_v55  ;;  %v857_v60 = vpack.c.bf16 %v576_v49, %v572_v47  ;;  %v516_v1 = vmul.f32 0.5, %v957_v51  ;;  %v579_v10 = vadd.f32 0.5, %v515_v58 }
  0xfd   :  { %v384_v59 = vpop.f32.mrb[15].mxu1  ;;  %v961_v61 = vpop.eup %960  ;;  %980 = vtanh.f32 %v223_v56  ;;  %v889_v63 = vpack.c.bf16 %v578_v54, %v574_v52  ;;  %v518_v5 = vmul.f32 0.5, %v959_v57  ;;  %v581_v15 = vadd.f32 0.5, %v517_v62 }
  0xfe   :  { %v963_v0 = vpop.eup %962  ;;  %v519_v2 = vmul.f32 0.5, %v961_v61  ;;  %982 = vtanh.f32 %v384_v59  ;;  %858 = vmatprep.subr.bf16.mxu0 %v857_v60  ;;  %v227_v3 = vpop.f32.mrb[16].mxu0  ;;  %v580_v19 = vadd.f32 0.5, %v516_v1 }
  0xff   :  { %v965_v4 = vpop.eup %964  ;;  %v521_v6 = vmul.f32 0.5, %v963_v0  ;;  %890 = vmatprep.subr.bf16.mxu1 %v889_v63  ;;  %984 = vtanh.f32 %v227_v3  ;;  %v388_v7 = vpop.f32.mrb[16].mxu1  ;;  %860 = vmatpush1.bf16.msra.mxu0 %v859_v48  ;;  %v582_v24 = vadd.f32 0.5, %v518_v5 }
 0x100   :  { %v229_v8 = vpop.f32.mrb[17].mxu0  ;;  %v967_v9 = vpop.eup %966  ;;  %v583_v11 = vadd.f32 0.5, %v519_v2  ;;  %v520_v12 = vmul.f32 0.5, %v965_v4  ;;  %986 = vtanh.f32 %v388_v7  ;;  %892 = vmatpush1.bf16.msra.mxu1 %v891_v53 }
 0x101   :  { %v390_v13 = vpop.f32.mrb[17].mxu1  ;;  %v969_v14 = vpop.eup %968  ;;  %v585_v16 = vadd.f32 0.5, %v521_v6  ;;  %v522_v17 = vmul.f32 0.5, %v967_v9  ;;  %988 = vtanh.f32 %v229_v8 }
 0x102   :  { %v971_v18 = vpop.eup %970  ;;  %v863_v20 = vpack.c.bf16 %v583_v11, %v579_v10  ;;  %v584_v21 = vadd.f32 0.5, %v520_v12  ;;  %990 = vtanh.f32 %v390_v13  ;;  %v233_v22 = vpop.f32.mrb[18].mxu0  ;;  %v523_v30 = vmul.f32 0.5, %v969_v14 }
 0x103   :  { %v973_v23 = vpop.eup %972  ;;  %v895_v25 = vpack.c.bf16 %v585_v16, %v581_v15  ;;  %v586_v26 = vadd.f32 0.5, %v522_v17  ;;  %992 = vtanh.f32 %v233_v22  ;;  %v394_v27 = vpop.f32.mrb[18].mxu1  ;;  %v525_v34 = vmul.f32 0.5, %v971_v18 }
 0x104   :  { %v235_v28 = vpop.f32.mrb[19].mxu0  ;;  %v975_v29 = vpop.eup %974  ;;  %994 = vtanh.f32 %v394_v27  ;;  %v861_v32 = vpack.c.bf16 %v584_v21, %v580_v19  ;;  %v524_v37 = vmul.f32 0.5, %v973_v23  ;;  %v587_v46 = vadd.f32 0.5, %v523_v30 }
 0x105   :  { %v396_v31 = vpop.f32.mrb[19].mxu1  ;;  %v977_v33 = vpop.eup %976  ;;  %996 = vtanh.f32 %v235_v28  ;;  %v893_v35 = vpack.c.bf16 %v586_v26, %v582_v24  ;;  %v526_v41 = vmul.f32 0.5, %v975_v29  ;;  %v589_v51 = vadd.f32 0.5, %v525_v34 }
 0x106   :  { %v979_v36 = vpop.eup %978  ;;  %v527_v38 = vmul.f32 0.5, %v977_v33  ;;  %998 = vtanh.f32 %v396_v31  ;;  %862 = vmatprep.subr.bf16.mxu0 %v861_v32  ;;  %v239_v39 = vpop.f32.mrb[20].mxu0  ;;  %v588_v55 = vadd.f32 0.5, %v524_v37 }
 0x107   :  { %v981_v40 = vpop.eup %980  ;;  %v529_v42 = vmul.f32 0.5, %v979_v36  ;;  %894 = vmatprep.subr.bf16.mxu1 %v893_v35  ;;  %1000 = vtanh.f32 %v239_v39  ;;  %v400_v43 = vpop.f32.mrb[20].mxu1  ;;  %864 = vmatpush1.bf16.msra.mxu0 %v863_v20  ;;  %v590_v60 = vadd.f32 0.5, %v526_v41 }
 0x108   :  { %v241_v44 = vpop.f32.mrb[21].mxu0  ;;  %v983_v45 = vpop.eup %982  ;;  %v591_v47 = vadd.f32 0.5, %v527_v38  ;;  %v528_v48 = vmul.f32 0.5, %v981_v40  ;;  %1002 = vtanh.f32 %v400_v43  ;;  %896 = vmatpush1.bf16.msra.mxu1 %v895_v25 }
 0x109   :  { %v402_v49 = vpop.f32.mrb[21].mxu1  ;;  %v985_v50 = vpop.eup %984  ;;  %v593_v52 = vadd.f32 0.5, %v529_v42  ;;  %v530_v53 = vmul.f32 0.5, %v983_v45  ;;  %1004 = vtanh.f32 %v241_v44 }
 0x10a   :  { %v987_v54 = vpop.eup %986  ;;  %v867_v56 = vpack.c.bf16 %v591_v47, %v587_v46  ;;  %v592_v57 = vadd.f32 0.5, %v528_v48  ;;  %1006 = vtanh.f32 %v402_v49  ;;  %v245_v58 = vpop.f32.mrb[22].mxu0  ;;  %v531_v2 = vmul.f32 0.5, %v985_v50 }
 0x10b   :  { %v989_v59 = vpop.eup %988  ;;  %v899_v61 = vpack.c.bf16 %v593_v52, %v589_v51  ;;  %v594_v62 = vadd.f32 0.5, %v530_v53  ;;  %1008 = vtanh.f32 %v245_v58  ;;  %v406_v63 = vpop.f32.mrb[22].mxu1  ;;  %v533_v6 = vmul.f32 0.5, %v987_v54 }
 0x10c   :  { %v247_v0 = vpop.f32.mrb[23].mxu0  ;;  %v991_v1 = vpop.eup %990  ;;  %1010 = vtanh.f32 %v406_v63  ;;  %v865_v4 = vpack.c.bf16 %v592_v57, %v588_v55  ;;  %v532_v9 = vmul.f32 0.5, %v989_v59  ;;  %v595_v18 = vadd.f32 0.5, %v531_v2 }
 0x10d   :  { %v408_v3 = vpop.f32.mrb[23].mxu1  ;;  %v993_v5 = vpop.eup %992  ;;  %1012 = vtanh.f32 %v247_v0  ;;  %v897_v7 = vpack.c.bf16 %v594_v62, %v590_v60  ;;  %v534_v13 = vmul.f32 0.5, %v991_v1  ;;  %v597_v23 = vadd.f32 0.5, %v533_v6 }
 0x10e   :  { %v995_v8 = vpop.eup %994  ;;  %v535_v10 = vmul.f32 0.5, %v993_v5  ;;  %1014 = vtanh.f32 %v408_v3  ;;  %866 = vmatprep.subr.bf16.mxu0 %v865_v4  ;;  %v251_v11 = vpop.f32.mrb[24].mxu0  ;;  %v596_v27 = vadd.f32 0.5, %v532_v9 }
 0x10f   :  { %v997_v12 = vpop.eup %996  ;;  %v537_v14 = vmul.f32 0.5, %v995_v8  ;;  %898 = vmatprep.subr.bf16.mxu1 %v897_v7  ;;  %1016 = vtanh.f32 %v251_v11  ;;  %v412_v15 = vpop.f32.mrb[24].mxu1  ;;  %868 = vmatpush1.bf16.msra.mxu0 %v867_v56  ;;  %v598_v32 = vadd.f32 0.5, %v534_v13 }
 0x110   :  { %v253_v16 = vpop.f32.mrb[25].mxu0  ;;  %v999_v17 = vpop.eup %998  ;;  %v599_v19 = vadd.f32 0.5, %v535_v10  ;;  %v536_v20 = vmul.f32 0.5, %v997_v12  ;;  %1018 = vtanh.f32 %v412_v15  ;;  %900 = vmatpush1.bf16.msra.mxu1 %v899_v61 }
 0x111   :  { %v414_v21 = vpop.f32.mrb[25].mxu1  ;;  %v1001_v22 = vpop.eup %1000  ;;  %v601_v24 = vadd.f32 0.5, %v537_v14  ;;  %v538_v25 = vmul.f32 0.5, %v999_v17  ;;  %1020 = vtanh.f32 %v253_v16 }
 0x112   :  { %v1003_v26 = vpop.eup %1002  ;;  %v871_v28 = vpack.c.bf16 %v599_v19, %v595_v18  ;;  %v600_v29 = vadd.f32 0.5, %v536_v20  ;;  %1022 = vtanh.f32 %v414_v21  ;;  %v257_v30 = vpop.f32.mrb[26].mxu0  ;;  %v539_v38 = vmul.f32 0.5, %v1001_v22 }
 0x113   :  { %v1005_v31 = vpop.eup %1004  ;;  %v903_v33 = vpack.c.bf16 %v601_v24, %v597_v23  ;;  %v602_v34 = vadd.f32 0.5, %v538_v25  ;;  %1024 = vtanh.f32 %v257_v30  ;;  %v418_v35 = vpop.f32.mrb[26].mxu1  ;;  %v541_v42 = vmul.f32 0.5, %v1003_v26 }
 0x114   :  { %v259_v36 = vpop.f32.mrb[27].mxu0  ;;  %v1007_v37 = vpop.eup %1006  ;;  %1026 = vtanh.f32 %v418_v35  ;;  %v869_v40 = vpack.c.bf16 %v600_v29, %v596_v27  ;;  %v540_v45 = vmul.f32 0.5, %v1005_v31  ;;  %v603_v54 = vadd.f32 0.5, %v539_v38 }
 0x115   :  { %v420_v39 = vpop.f32.mrb[27].mxu1  ;;  %v1009_v41 = vpop.eup %1008  ;;  %1028 = vtanh.f32 %v259_v36  ;;  %v901_v43 = vpack.c.bf16 %v602_v34, %v598_v32  ;;  %v542_v49 = vmul.f32 0.5, %v1007_v37  ;;  %v605_v59 = vadd.f32 0.5, %v541_v42 }
 0x116   :  { %v1011_v44 = vpop.eup %1010  ;;  %v543_v46 = vmul.f32 0.5, %v1009_v41  ;;  %1030 = vtanh.f32 %v420_v39  ;;  %870 = vmatprep.subr.bf16.mxu0 %v869_v40  ;;  %v263_v47 = vpop.f32.mrb[28].mxu0  ;;  %v604_v63 = vadd.f32 0.5, %v540_v45 }
 0x117   :  { %v1013_v48 = vpop.eup %1012  ;;  %v545_v50 = vmul.f32 0.5, %v1011_v44  ;;  %902 = vmatprep.subr.bf16.mxu1 %v901_v43  ;;  %1032 = vtanh.f32 %v263_v47  ;;  %v424_v51 = vpop.f32.mrb[28].mxu1  ;;  %872 = vmatpush1.bf16.msra.mxu0 %v871_v28  ;;  %v606_v4 = vadd.f32 0.5, %v542_v49 }
 0x118   :  { %v265_v52 = vpop.f32.mrb[29].mxu0  ;;  %v1015_v53 = vpop.eup %1014  ;;  %v607_v55 = vadd.f32 0.5, %v543_v46  ;;  %v544_v56 = vmul.f32 0.5, %v1013_v48  ;;  %1034 = vtanh.f32 %v424_v51  ;;  %904 = vmatpush1.bf16.msra.mxu1 %v903_v33 }
 0x119   :  { %v426_v57 = vpop.f32.mrb[29].mxu1  ;;  %v1017_v58 = vpop.eup %1016  ;;  %v609_v60 = vadd.f32 0.5, %v545_v50  ;;  %v546_v61 = vmul.f32 0.5, %v1015_v53  ;;  %1036 = vtanh.f32 %v265_v52  ;;  %v628_v50 = vlaneseq }
 0x11a   :  { %v1019_v62 = vpop.eup %1018  ;;  %v875_v0 = vpack.c.bf16 %v607_v55, %v603_v54  ;;  %v608_v1 = vadd.f32 0.5, %v544_v56  ;;  %1038 = vtanh.f32 %v426_v57  ;;  %v269_v2 = vpop.f32.mrb[30].mxu0  ;;  %v547_v10 = vmul.f32 0.5, %v1017_v58 }
 0x11b   :  { %v1021_v3 = vpop.eup %1020  ;;  %v907_v5 = vpack.c.bf16 %v609_v60, %v605_v59  ;;  %v610_v6 = vadd.f32 0.5, %v546_v61  ;;  %1040 = vtanh.f32 %v269_v2  ;;  %v430_v7 = vpop.f32.mrb[30].mxu1  ;;  %v549_v14 = vmul.f32 0.5, %v1019_v62  ;;  %v841_v2 = vld [vmem:[%s1261_s1] ss:$0 sm:$0xff]  ;;  %s1048_s1 = scalar_lea.vmem %s798_s14, 512 }
 0x11c   :  { %v271_v8 = vpop.f32.mrb[31].mxu0  ;;  %v1023_v9 = vpop.eup %1022  ;;  %1042 = vtanh.f32 %v430_v7  ;;  %v873_v12 = vpack.c.bf16 %v608_v1, %v604_v63  ;;  %v548_v17 = vmul.f32 0.5, %v1021_v3  ;;  %v611_v23 = vadd.f32 0.5, %v547_v10  ;;  %p1049_p0 = scmp.ne.s32.totalorder %s798_s14, %s1048_s1  ;;  %p1054_p2 = scmp.lt.s32.totalorder %s1048_s1, %s1048_s1 }
 0x11d   :  { %v432_v11 = vpop.f32.mrb[31].mxu1  ;;  %v1025_v13 = vpop.eup %1024  ;;  %1044 = vtanh.f32 %v271_v8  ;;  %v905_v15 = vpack.c.bf16 %v610_v6, %v606_v4  ;;  %v550_v20 = vmul.f32 0.5, %v1023_v9  ;;  %v613_v27 = vadd.f32 0.5, %v549_v14 }
 0x11e   :  { %v1027_v16 = vpop.eup %1026  ;;  %v551_v18 = vmul.f32 0.5, %v1025_v13  ;;  %1046 = vtanh.f32 %v432_v11  ;;  %874 = vmatprep.subr.bf16.mxu0 %v873_v12  ;;  %v612_v31 = vadd.f32 0.5, %v548_v17  ;;  %v1073_v4 = vmov 1.0   ;;  %p1055_p3 = por %p1054_p2, %p1053_p1 }
 0x11f   :  { %v1029_v19 = vpop.eup %1028  ;;  %v553_v21 = vmul.f32 0.5, %v1027_v16  ;;  %906 = vmatprep.subr.bf16.mxu1 %v905_v15  ;;  %876 = vmatpush1.bf16.msra.mxu0 %v875_v0  ;;  %v614_v35 = vadd.f32 0.5, %v550_v20  ;;  %v629_v0 = vshrl.u32 %v628_v50, 7 }
 0x120   :  { %v1031_v22 = vpop.eup %1030  ;;  %v615_v24 = vadd.f32 0.5, %v551_v18  ;;  %v552_v25 = vmul.f32 0.5, %v1029_v19  ;;  %908 = vmatpush1.bf16.msra.mxu1 %v907_v5  ;;  %p1056_p4 = pnand %p1055_p3, %p1049_p0 }
 0x121   :  { %v1033_v26 = vpop.eup %1032  ;;  %v617_v28 = vadd.f32 0.5, %v553_v21  ;;  %v554_v29 = vmul.f32 0.5, %v1031_v22  ;;  %vm634_vm2 = vcmp.eq.s32.totalorder %v629_v0, %v841_v2 }
 0x122   :  { %v1035_v30 = vpop.eup %1034  ;;  %v879_v32 = vpack.c.bf16 %v615_v24, %v611_v23  ;;  %v616_v33 = vadd.f32 0.5, %v552_v25  ;;  %v555_v39 = vmul.f32 0.5, %v1033_v26 }
 0x123   :  { %v1037_v34 = vpop.eup %1036  ;;  %v911_v36 = vpack.c.bf16 %v617_v28, %v613_v27  ;;  %v618_v37 = vadd.f32 0.5, %v554_v29  ;;  %v557_v42 = vmul.f32 0.5, %v1035_v30 }
 0x124   :  { %v1039_v38 = vpop.eup %1038  ;;  %v877_v40 = vpack.c.bf16 %v616_v33, %v612_v31  ;;  %v556_v45 = vmul.f32 0.5, %v1037_v34  ;;  %v619_v52 = vadd.f32 0.5, %v555_v39 }
 0x125   :  { %v1041_v41 = vpop.eup %1040  ;;  %v909_v43 = vpack.c.bf16 %v618_v37, %v614_v35  ;;  %v558_v48 = vmul.f32 0.5, %v1039_v38  ;;  %v621_v55 = vadd.f32 0.5, %v557_v42 }
 0x126   :  { %v1043_v44 = vpop.eup %1042  ;;  %v559_v46 = vmul.f32 0.5, %v1041_v41  ;;  %878 = vmatprep.subr.bf16.mxu0 %v877_v40  ;;  %v620_v58 = vadd.f32 0.5, %v556_v45 }
 0x127   :  { %v1045_v47 = vpop.eup %1044  ;;  %v561_v49 = vmul.f32 0.5, %v1043_v44  ;;  %910 = vmatprep.subr.bf16.mxu1 %v909_v43  ;;  %880 = vmatpush1.bf16.msra.mxu0 %v879_v32  ;;  %v622_v61 = vadd.f32 0.5, %v558_v48 }
 0x128   :  { %v1047_v51 = vpop.eup %1046  ;;  %v623_v53 = vadd.f32 0.5, %v559_v46  ;;  %v560_v54 = vmul.f32 0.5, %v1045_v47  ;;  %912 = vmatpush1.bf16.msra.mxu1 %v911_v36 }
 0x129   :  { %v625_v56 = vadd.f32 0.5, %v561_v49  ;;  %v562_v57 = vmul.f32 0.5, %v1047_v51 }
 0x12a   :  { %v883_v59 = vpack.c.bf16 %v623_v53, %v619_v52  ;;  %v624_v60 = vadd.f32 0.5, %v560_v54 }
 0x12b   :  { %v915_v62 = vpack.c.bf16 %v625_v56, %v621_v55  ;;  %v626_v63 = vadd.f32 0.5, %v562_v57 }
 0x12c   :  { %v881_v1 = vpack.c.bf16 %v624_v60, %v620_v58 }
 0x12d   :  { %v913_v3 = vpack.c.bf16 %v626_v63, %v622_v61 }
 0x12e   :  { %882 = vmatprep.subr.bf16.mxu0 %v881_v1 }
 0x12f   :  { %914 = vmatprep.subr.bf16.mxu1 %v913_v3  ;;  %884 = vmatpush1.bf16.msra.mxu0 %v883_v59 }
 0x130   :  { %916 = vmatpush1.bf16.msra.mxu1 %v915_v62 }
 0x132   :  { %843 = vmatmul.mubr.msk.f32.vlgmr.msra.gmra.mrb[32].mxu0 %vm634_vm2, %v1073_v4 }
 0x133   :  { %844 = vmatmul.mubr.msk.f32.vlgmr.msra.gmra.mrb[32].mxu1 %vm634_vm2, %v1073_v4 }
 0x205   :  { %v707_v5 = vpop.f32.mrb[32].mxu0 }
 0x206   :  { %v778_v6 = vpop.f32.mrb[32].mxu1  ;;  %v709_v7 = vpop.f32.mrb[33].mxu0  ;;  %787 = vst [vmem:[#allocation2] sm:$0xff] %v707_v5 }
 0x207   :  { %v780_v8 = vpop.f32.mrb[33].mxu1  ;;  %789 = vst [vmem:[#allocation2 + $0x10] sm:$0xff] %v778_v6  ;;  %788 = vst [vmem:[#allocation2 + $0x8] sm:$0xff] %v709_v7 }
 0x208   :  { %790 = vst [vmem:[#allocation2 + $0x18] sm:$0xff] %v780_v8 }
 0x209   :  { %1059 = shalt.err (!%p1056_p4)
}
 0x20a   :  { %s1060_s17 = scalar_lea.hbm %s1263_s3, 512 }
 0x20b   :  { %p1061_p5 = scmp.ne.s32.totalorder %s1263_s3, %s1060_s17  ;;  %p1064_p6 = scmp.lt.u32.totalorder %s1060_s17, %s1263_s3 }
 0x20d   :  { %p1066_p7 = pnand %p1064_p6, %p1061_p5 }
 0x20f   :  { %1069 = shalt.err (!%p1066_p7)
}
 0x210   :  { %800 = dma.vmem_to_hbm [thread:$0]  %s798_s14, 512, %s1263_s3, [#allocation3]  }
 0x211   :  { %1070 = dma.done.wait [#allocation3], 512  }
 0x212   :  { %1071 = vsyncadd [#allocation3], 4294966784 }
 0x213   :  { %804 = vsyncpa [#allocation3], 1 }

</bundles_post_ra>
